<compile_context>
chip_gen: v7x
topology: tpu7x:2x2x1
jax: 0.10.0
libtpu: 0.0.40
codegen_flags: <defaults>
</compile_context>

<pallas_src>
import numpy as np
import jax
import jax.numpy as jnp
from jax import lax
from jax.experimental import pallas as pl
from jax.experimental.pallas import tpu as pltpu

GRID = 8                       # grid_size of the PyTorch module
N_CELLS = GRID * GRID          # 64 sudoku cells


# ----------------------------------------------------------------------------
# static sudoku graph (same construction as RRN.sudoku_edges for grid_size=8)
# ----------------------------------------------------------------------------
def sudoku_edges(grid_size=GRID):
    idx = np.arange(grid_size * grid_size).reshape(grid_size, grid_size)

    def cross(a):
        a = a.flatten()
        return np.array([[i for i in a if i != j] for j in a])

    rows = -np.ones((grid_size * grid_size, grid_size - 1), dtype=np.int64)
    cols = rows.copy()
    sqs = rows.copy()
    for i in range(grid_size):
        rows[idx[i, :].flatten()] = cross(idx[i, :])
        cols[idx[:, i].flatten()] = cross(idx[:, i])
    # grid_size == 8 -> 2x4 blocks
    for i in range(4):
        for j in range(2):
            blk = idx[i * 2:(i + 1) * 2, j * 4:(j + 1) * 4]
            sqs[blk.flatten()] = cross(blk)
    edges = []
    for j in range(grid_size * grid_size):
        edges.append(sorted(set(list(rows[j]) + list(cols[j]) + list(sqs[j]))))
    deg = len(edges[0])
    assert all(len(e) == deg for e in edges)
    return np.array(edges, dtype=np.int32)        # (64, 17)


# ----------------------------------------------------------------------------
# Pallas kernels
# ----------------------------------------------------------------------------
def mlp4_kernel(x_ref, w1, b1, w2, b2, w3, b3, w4, b4, o_ref):
    """def_MLP: Linear->ReLU->Linear->ReLU->Linear->ReLU->Linear (no final ReLU)."""
    f32 = jnp.float32
    y = jnp.maximum(jnp.dot(x_ref[...], w1[...], preferred_element_type=f32) + b1[...], 0.0)
    y = jnp.maximum(jnp.dot(y, w2[...], preferred_element_type=f32) + b2[...], 0.0)
    y = jnp.maximum(jnp.dot(y, w3[...], preferred_element_type=f32) + b3[...], 0.0)
    o_ref[...] = jnp.dot(y, w4[...], preferred_element_type=f32) + b4[...]


def mlp4_pallas(x, ws):
    out_dim = ws[6].shape[1]
    vmem = lambda: pl.BlockSpec(memory_space=pltpu.MemorySpace.VMEM)
    return pl.pallas_call(
        mlp4_kernel,
        out_shape=jax.ShapeDtypeStruct((x.shape[0], out_dim), jnp.float32),
        in_specs=[vmem() for _ in range(9)],
        out_specs=vmem(),
    )(x, *ws)


def rrn_fused_kernel(xg_ref, tgt_ref, gcat_ref, ssum_ref,
                     mw1a, mw1b, mb1, mw2, mb2, mw3, mb3, mw4, mb4,
                     wihm, whh, wp, bp,
                     lp_out, tgtlp_out, corr_out,
                     h_s, c_s):
    """All n_steps of the RRN recurrence for one group of G boards (grid = (group, step))."""
    f32 = jnp.float32
    bf16 = jnp.bfloat16
    t = pl.program_id(1)
    H = mw1a.shape[0]
    GN = h_s.shape[0]

    @pl.when(t == 0)
    def _init():
        h_s[...] = jnp.zeros_like(h_s)
        c_s[...] = jnp.zeros_like(c_s)

    h = h_s[...]                                                        # (GN, H)

    # --- message passing: project first (associativity), then ONE block-diag 0/1
    #     gather matmul over [neighbor-proj ; self-proj] with K = 2*GN (fills MXU).
    ha = jnp.dot(h, mw1a[...], preferred_element_type=f32)              # neighbor part
    hb = jnp.dot(h, mw1b[...], preferred_element_type=f32)              # self part
    hcat = jnp.concatenate([ha, hb], axis=0).astype(bf16)               # (2*GN, H)
    m = jnp.dot(gcat_ref[...], hcat, preferred_element_type=f32) + mb1[...]
    m = jnp.maximum(m, 0.0)
    m = jnp.maximum(jnp.dot(m, mw2[...], preferred_element_type=f32) + mb2[...], 0.0)
    m = jnp.maximum(jnp.dot(m, mw3[...], preferred_element_type=f32) + mb3[...], 0.0)
    m = jnp.dot(m, mw4[...], preferred_element_type=f32) + mb4[...]     # (G*E, H)

    # per-node edge sum as one 0/1 matmul (K = G*E)
    msg = jnp.dot(ssum_ref[...], m.astype(bf16), preferred_element_type=f32)   # (GN, H)

    # --- LSTMCell; x @ W_ih[x-part] + bias is hoisted into xg_ref (step-invariant) ---
    # NOTE: kept as two K=H dots rather than a minor-dim concat of [msg, h] for robustness.
    gates = (jnp.dot(msg, wihm[...], preferred_element_type=f32)
             + jnp.dot(h, whh[...], preferred_element_type=f32)
             + xg_ref[...])                                             # (GN, 4H)
    lane = lax.broadcasted_iota(jnp.int32, gates.shape, 1)
    act = jnp.where((lane >= 2 * H) & (lane < 3 * H),
                    jnp.tanh(gates), jax.nn.sigmoid(gates))             # lane-dense gate act
    i_g = act[:, 0:H]
    f_g = act[:, H:2 * H]
    g_g = act[:, 2 * H:3 * H]
    o_g = act[:, 3 * H:4 * H]
    c_new = f_g * c_s[...] + i_g * g_g
    h_new = o_g * jnp.tanh(c_new)
    h_s[...] = h_new
    c_s[...] = c_new

    # --- prediction head + log_softmax; emit tiny per-step stats, lp resident (final) ---
    logits = jnp.dot(h_new, wp[...], preferred_element_type=f32) + bp[...]      # (GN, GRID)
    mx = jnp.max(logits, axis=1, keepdims=True)
    lse = jnp.log(jnp.sum(jnp.exp(logits - mx), axis=1, keepdims=True))
    lp = logits - mx - lse
    lp_out[...] = lp                                   # constant index over t -> final step survives

    tgt_lp = jnp.sum(lp * tgt_ref[...], axis=1, keepdims=True)          # (GN, 1)
    corr = (tgt_lp >= -lse).astype(f32)                                 # max(lp) == -lse
    tgtlp_out[...] = tgt_lp.reshape(1, GN, 1)
    corr_out[...] = corr.reshape(1, GN, 1)


def rrn_fused_pallas(xg, tgt_oh, gcat, ssum, p, n_steps, n_groups, G):
    N, H4 = xg.shape
    H = H4 // 4
    GN = G * N_CELLS
    GR = p['pred_w'].shape[1]

    def const(arr):                      # whole-array block, fetched once (constant index)
        shape = arr.shape
        return pl.BlockSpec(shape, lambda *_: (0,) * len(shape))

    args = (xg, tgt_oh, gcat, ssum,
            p['msg_w1'][:H], p['msg_w1'][H:], p['msg_b1'],
            p['msg_w2'], p['msg_b2'], p['msg_w3'], p['msg_b3'],
            p['msg_w4'], p['msg_b4'],
            p['lstm_wih'][:H], p['lstm_whh'], p['pred_w'], p['pred_b'])

    in_specs = ([pl.BlockSpec((GN, H4), lambda g, t: (g, 0)),           # xg   (per group)
                 pl.BlockSpec((GN, GR), lambda g, t: (g, 0))]           # tgt  (per group)
                + [const(a) for a in args[2:]])

    out_shape = (jax.ShapeDtypeStruct((N, GR), jnp.float32),            # final-step log-probs
                 jax.ShapeDtypeStruct((n_steps, N, 1), jnp.float32),    # per-cell target logp
                 jax.ShapeDtypeStruct((n_steps, N, 1), jnp.float32))    # per-cell correct flag
    out_specs = (pl.BlockSpec((GN, GR), lambda g, t: (g, 0)),
                 pl.BlockSpec((1, GN, 1), lambda g, t: (t, g, 0)),
                 pl.BlockSpec((1, GN, 1), lambda g, t: (t, g, 0)))

    return pl.pallas_call(
        rrn_fused_kernel,
        grid=(n_groups, n_steps),
        in_specs=in_specs,
        out_specs=out_specs,
        out_shape=out_shape,
        scratch_shapes=[pltpu.VMEM((GN, H), jnp.float32),    # h state (resident across steps)
                        pltpu.VMEM((GN, H), jnp.float32)],   # c state
        compiler_params=pltpu.CompilerParams(
            dimension_semantics=("parallel", "arbitrary"),
            vmem_limit_bytes=48 * 1024 * 1024),
    )(*args)


# ----------------------------------------------------------------------------
# host glue: per-GROUP 0/1 gather / edge-sum matrices (linear in batch, not O(B^2))
# ----------------------------------------------------------------------------
def build_group_mats(edges, G):
    deg = edges.shape[1]
    E = N_CELLS * deg
    gnb1 = np.zeros((E, N_CELLS), np.float32)
    gself1 = np.zeros((E, N_CELLS), np.float32)
    for i in range(N_CELLS):
        for e in range(deg):
            gnb1[i * deg + e, edges[i, e]] = 1.0
            gself1[i * deg + e, i] = 1.0
    eye_g = np.eye(G, dtype=np.float32)
    gnb = np.kron(eye_g, gnb1)                    # (G*E, G*64) neighbor gather
    gslf = np.kron(eye_g, gself1)                 # (G*E, G*64) self gather
    gcat = np.concatenate([gnb, gslf], axis=1)    # (G*E, 2*G*64)  -> acts on [h@W1a ; h@W1b]
    ssum = np.kron(eye_g, gself1.T)               # (G*64, G*E)    edge sum
    return jnp.asarray(gcat, jnp.bfloat16), jnp.asarray(ssum, jnp.bfloat16)   # 0/1: exact in bf16


# ----------------------------------------------------------------------------
# RRN forward (one-time glue in plain JAX, full recurrence in one Pallas call)
# ----------------------------------------------------------------------------
def rrn_forward(puzzle, target, params, edges, n_steps):
    B = puzzle.shape[0]
    H = params['lstm_whh'].shape[0]
    E = params['digit_embed'].shape[1]
    N = B * N_CELLS
    G = 4 if B % 4 == 0 else (2 if B % 2 == 0 else 1)   # boards per group (MXU K filling)
    n_groups = B // G

    # --- one-time: embeddings (gather glue) + input_func MLP (Pallas) ---
    x_flat = puzzle.reshape(B, -1)
    dig = params['digit_embed'][x_flat]                               # (B, 64, E)
    row_idx = np.repeat(np.arange(GRID), GRID)
    col_idx = np.tile(np.arange(GRID), GRID)
    rowe = jnp.broadcast_to(params['row_embed'][row_idx], (B, N_CELLS, E))
    cole = jnp.broadcast_to(params['col_embed'][col_idx], (B, N_CELLS, E))
    emb = jnp.concatenate([dig, rowe, cole], axis=-1).reshape(N, 3 * E)
    x_in = mlp4_pallas(emb, tuple(params['input_func']))              # (N, H)

    # hoist the step-invariant LSTM input contribution (x @ W_ih[x-part] + bias)
    xg = x_in @ params['lstm_wih'][H:] + params['lstm_b']             # (N, 4H)

    gcat, ssum = build_group_mats(edges, G)
    tgt_oh = jax.nn.one_hot(target.reshape(-1) - 1, GRID, dtype=jnp.float32)   # (N, GRID)

    lp, tgtlp, corr = rrn_fused_pallas(xg, tgt_oh, gcat, ssum, params,
                                       n_steps, n_groups, G)

    # device-side reductions; single host transfer for the acc list after the loop
    loss = -jnp.sum(tgtlp) / (N * n_steps)
    correct = jnp.sum(corr.reshape(n_steps, B, N_CELLS), axis=2)
    accs_dev = jnp.mean((correct == N_CELLS).astype(jnp.float32), axis=1)      # (n_steps,)
    final_pred = jnp.argmax(lp, axis=-1).reshape(B, N_CELLS)
    accs = [float(a) for a in np.asarray(accs_dev)]                   # one device->host copy
    return loss, accs, final_pred


# ----------------------------------------------------------------------------
# pure-JAX reference (mirrors the PyTorch forward) for a correctness check
# ----------------------------------------------------------------------------
def rrn_reference(puzzle, target, params, edges, n_steps):
    B = puzzle.shape[0]
    H = params['lstm_whh'].shape[0]
    E = params['digit_embed'].shape[1]

    def mlp(x, ws):
        w1, b1, w2, b2, w3, b3, w4, b4 = ws
        y = jax.nn.relu(x @ w1 + b1)
        y = jax.nn.relu(y @ w2 + b2)
        y = jax.nn.relu(y @ w3 + b3)
        return y @ w4 + b4

    x_flat = puzzle.reshape(B, -1)
    dig = params['digit_embed'][x_flat]
    row_idx = np.repeat(np.arange(GRID), GRID)
    col_idx = np.tile(np.arange(GRID), GRID)
    rowe = jnp.broadcast_to(params['row_embed'][row_idx], (B, N_CELLS, E))
    cole = jnp.broadcast_to(params['col_embed'][col_idx], (B, N_CELLS, E))
    x_in = mlp(jnp.concatenate([dig, rowe, cole], -1), params['input_func'])   # (B,64,H)

    msg_ws = (params['msg_w1'], params['msg_b1'], params['msg_w2'], params['msg_b2'],
              params['msg_w3'], params['msg_b3'], params['msg_w4'], params['msg_b4'])
    edges_j = jnp.asarray(edges)
    h = jnp.zeros((B, N_CELLS, H), jnp.float32)
    s = jnp.zeros((B * N_CELLS, H), jnp.float32)
    loss = jnp.zeros((), jnp.float32)
    tgt_flat = target.reshape(-1) - 1
    lp = None
    for _ in range(n_steps):
        h_edges = h[:, edges_j]                                       # (B,64,deg,H)
        h_exp = jnp.broadcast_to(h[:, :, None, :], h_edges.shape)
        m = mlp(jnp.concatenate([h_edges, h_exp], -1), msg_ws)
        msg = jnp.sum(m, axis=2)
        lstm_in = jnp.concatenate([msg, x_in], axis=2).reshape(-1, 2 * H)
        hf = h.reshape(-1, H)
        gates = lstm_in @ params['lstm_wih'] + hf @ params['lstm_whh'] + params['lstm_b']
        i_g = jax.nn.sigmoid(gates[:, :H])
        f_g = jax.nn.sigmoid(gates[:, H:2 * H])
        g_g = jnp.tanh(gates[:, 2 * H:3 * H])
        o_g = jax.nn.sigmoid(gates[:, 3 * H:])
        s = f_g * s + i_g * g_g
        hf = o_g * jnp.tanh(s)
        h = hf.reshape(B, N_CELLS, H)
        logits = h @ params['pred_w'] + params['pred_b']
        lp = jax.nn.log_softmax(logits, axis=2).reshape(-1, GRID)
        loss = loss - jnp.sum(lp[jnp.arange(lp.shape[0]), tgt_flat]) / (B * N_CELLS)
    loss = loss / n_steps
    final_pred = jnp.argmax(lp.reshape(B, N_CELLS, GRID), axis=2)
    return loss, final_pred


# ----------------------------------------------------------------------------
# deterministic parameter init (shapes from RRN.__init__)
# ----------------------------------------------------------------------------
def linear_params(key, fan_in, fan_out):
    kw, kb = jax.random.split(key)
    bound = 1.0 / np.sqrt(fan_in)
    w = jax.random.uniform(kw, (fan_in, fan_out), jnp.float32, -bound, bound)
    b = jax.random.uniform(kb, (1, fan_out), jnp.float32, -bound, bound)
    return w, b


def mlp_params(key, in_dim, out_dim):
    ks = jax.random.split(key, 4)
    w1, b1 = linear_params(ks[0], in_dim, out_dim)
    w2, b2 = linear_params(ks[1], out_dim, out_dim)
    w3, b3 = linear_params(ks[2], out_dim, out_dim)
    w4, b4 = linear_params(ks[3], out_dim, out_dim)
    return (w1, b1, w2, b2, w3, b3, w4, b4)


def make_params(key, E, H):
    keys = jax.random.split(key, 8)
    params = {}
    params['digit_embed'] = jax.random.normal(keys[0], (GRID + 1, E), jnp.float32)
    params['row_embed'] = jax.random.normal(keys[1], (GRID, E), jnp.float32)
    params['col_embed'] = jax.random.normal(keys[2], (GRID, E), jnp.float32)
    params['input_func'] = mlp_params(keys[3], 3 * E, H)
    (params['msg_w1'], params['msg_b1'], params['msg_w2'], params['msg_b2'],
     params['msg_w3'], params['msg_b3'], params['msg_w4'], params['msg_b4']) = \
        mlp_params(keys[4], 2 * H, H)
    bound = 1.0 / np.sqrt(H)
    kk = jax.random.split(keys[5], 4)
    params['lstm_wih'] = jax.random.uniform(kk[0], (2 * H, 4 * H), jnp.float32, -bound, bound)
    params['lstm_whh'] = jax.random.uniform(kk[1], (H, 4 * H), jnp.float32, -bound, bound)
    b_ih = jax.random.uniform(kk[2], (1, 4 * H), jnp.float32, -bound, bound)
    b_hh = jax.random.uniform(kk[3], (1, 4 * H), jnp.float32, -bound, bound)
    params['lstm_b'] = b_ih + b_hh
    params['pred_w'], params['pred_b'] = linear_params(keys[6], H, GRID)
    return params


if __name__ == "__main__":
    key = jax.random.PRNGKey(0)
    B, E, H = 2, 16, 32
    n_steps = 4   # small n_steps for the demo (module default is 32)

    kp, kx, kt = jax.random.split(key, 3)
    params = make_params(kp, E, H)
    puzzle = jax.random.randint(kx, (B, GRID, GRID), 0, GRID + 1)   # digits 0..8 (0 = blank)
    target = jax.random.randint(kt, (B, GRID, GRID), 1, GRID + 1)   # solution digits 1..8

    edges = sudoku_edges(GRID)

    loss, accs, final_pred = rrn_forward(puzzle, target, params, edges, n_steps)
    jax.block_until_ready((loss, final_pred))

    ref_loss, ref_pred = rrn_reference(puzzle, target, params, edges, n_steps)
    # gather/scatter matmuls run with bf16 operands (f32 accumulate) -> slightly relaxed tol
    np.testing.assert_allclose(np.asarray(loss), np.asarray(ref_loss), rtol=3e-2, atol=3e-2)
    assert final_pred.shape == (B, N_CELLS)
    assert len(accs) == n_steps
    agree = float(np.mean(np.asarray(final_pred) == np.asarray(ref_pred)))
    assert agree > 0.85, f"pred agreement {agree}"

    print("KERNEL_OK")
</pallas_src>

<mosaic_0001>
module attributes {stable_mosaic.version = 11 : i64} {
  func.func @mlp4_kernel(%arg0: memref<128x48xf32, #tpu.memory_space<vmem>>, %arg1: memref<48x32xf32, #tpu.memory_space<vmem>>, %arg2: memref<1x32xf32, #tpu.memory_space<vmem>>, %arg3: memref<32x32xf32, #tpu.memory_space<vmem>>, %arg4: memref<1x32xf32, #tpu.memory_space<vmem>>, %arg5: memref<32x32xf32, #tpu.memory_space<vmem>>, %arg6: memref<1x32xf32, #tpu.memory_space<vmem>>, %arg7: memref<32x32xf32, #tpu.memory_space<vmem>>, %arg8: memref<1x32xf32, #tpu.memory_space<vmem>>, %arg9: memref<128x32xf32, #tpu.memory_space<vmem>>) attributes {dimension_semantics = [], scalar_prefetch = 0 : i64, scratch_operands = 0 : i64, tpu.core_type = #tpu.core_type<tc>} {
    %c0 = arith.constant 0 : index
    %c0_0 = arith.constant 0 : index
    %0 = vector.load %arg0[%c0, %c0_0] : memref<128x48xf32, #tpu.memory_space<vmem>>, vector<128x48xf32>
    %c0_1 = arith.constant 0 : index
    %c0_2 = arith.constant 0 : index
    %1 = vector.load %arg1[%c0_1, %c0_2] : memref<48x32xf32, #tpu.memory_space<vmem>>, vector<48x32xf32>
    %cst = arith.constant dense<0.000000e+00> : vector<128x32xf32>
    %2 = tpu.matmul %0, %1, %cst {dimension_numbers = #tpu.dot_dimension_numbers<[1], [0], [0], [1], [0, 0, 1, 1], [], []>} : vector<128x48xf32>, vector<48x32xf32>, vector<128x32xf32> -> vector<128x32xf32>
    %c0_3 = arith.constant 0 : index
    %c0_4 = arith.constant 0 : index
    %3 = vector.load %arg2[%c0_3, %c0_4] : memref<1x32xf32, #tpu.memory_space<vmem>>, vector<1x32xf32>
    %4 = vector.broadcast %3 : vector<1x32xf32> to vector<128x32xf32>
    %5 = arith.addf %2, %4 : vector<128x32xf32>
    %cst_5 = arith.constant 0.000000e+00 : f32
    %6 = vector.broadcast %cst_5 : f32 to vector<128x32xf32>
    %7 = arith.maximumf %5, %6 : vector<128x32xf32>
    %c0_6 = arith.constant 0 : index
    %c0_7 = arith.constant 0 : index
    %8 = vector.load %arg3[%c0_6, %c0_7] : memref<32x32xf32, #tpu.memory_space<vmem>>, vector<32x32xf32>
    %cst_8 = arith.constant dense<0.000000e+00> : vector<128x32xf32>
    %9 = tpu.matmul %7, %8, %cst_8 {dimension_numbers = #tpu.dot_dimension_numbers<[1], [0], [0], [1], [0, 0, 1, 1], [], []>} : vector<128x32xf32>, vector<32x32xf32>, vector<128x32xf32> -> vector<128x32xf32>
    %c0_9 = arith.constant 0 : index
    %c0_10 = arith.constant 0 : index
    %10 = vector.load %arg4[%c0_9, %c0_10] : memref<1x32xf32, #tpu.memory_space<vmem>>, vector<1x32xf32>
    %11 = vector.broadcast %10 : vector<1x32xf32> to vector<128x32xf32>
    %12 = arith.addf %9, %11 : vector<128x32xf32>
    %cst_11 = arith.constant 0.000000e+00 : f32
    %13 = vector.broadcast %cst_11 : f32 to vector<128x32xf32>
    %14 = arith.maximumf %12, %13 : vector<128x32xf32>
    %c0_12 = arith.constant 0 : index
    %c0_13 = arith.constant 0 : index
    %15 = vector.load %arg5[%c0_12, %c0_13] : memref<32x32xf32, #tpu.memory_space<vmem>>, vector<32x32xf32>
    %cst_14 = arith.constant dense<0.000000e+00> : vector<128x32xf32>
    %16 = tpu.matmul %14, %15, %cst_14 {dimension_numbers = #tpu.dot_dimension_numbers<[1], [0], [0], [1], [0, 0, 1, 1], [], []>} : vector<128x32xf32>, vector<32x32xf32>, vector<128x32xf32> -> vector<128x32xf32>
    %c0_15 = arith.constant 0 : index
    %c0_16 = arith.constant 0 : index
    %17 = vector.load %arg6[%c0_15, %c0_16] : memref<1x32xf32, #tpu.memory_space<vmem>>, vector<1x32xf32>
    %18 = vector.broadcast %17 : vector<1x32xf32> to vector<128x32xf32>
    %19 = arith.addf %16, %18 : vector<128x32xf32>
    %cst_17 = arith.constant 0.000000e+00 : f32
    %20 = vector.broadcast %cst_17 : f32 to vector<128x32xf32>
    %21 = arith.maximumf %19, %20 : vector<128x32xf32>
    %c0_18 = arith.constant 0 : index
    %c0_19 = arith.constant 0 : index
    %22 = vector.load %arg7[%c0_18, %c0_19] : memref<32x32xf32, #tpu.memory_space<vmem>>, vector<32x32xf32>
    %cst_20 = arith.constant dense<0.000000e+00> : vector<128x32xf32>
    %23 = tpu.matmul %21, %22, %cst_20 {dimension_numbers = #tpu.dot_dimension_numbers<[1], [0], [0], [1], [0, 0, 1, 1], [], []>} : vector<128x32xf32>, vector<32x32xf32>, vector<128x32xf32> -> vector<128x32xf32>
    %c0_21 = arith.constant 0 : index
    %c0_22 = arith.constant 0 : index
    %24 = vector.load %arg8[%c0_21, %c0_22] : memref<1x32xf32, #tpu.memory_space<vmem>>, vector<1x32xf32>
    %25 = vector.broadcast %24 : vector<1x32xf32> to vector<128x32xf32>
    %26 = arith.addf %23, %25 : vector<128x32xf32>
    %c0_23 = arith.constant 0 : index
    %c0_24 = arith.constant 0 : index
    %27 = vector.load %arg9[%c0_23, %c0_24] : memref<128x32xf32, #tpu.memory_space<vmem>>, vector<128x32xf32>
    tpu.vector_store %arg9[%c0_23, %c0_24], %26 {strides = array<i32>} : memref<128x32xf32, #tpu.memory_space<vmem>>, vector<128x32xf32>,
    return
  }
}

</mosaic_0001>

<bundles_post_ra>
// kernel: tpu_custom_call.1
= control target key start
LH: loop header
LB: loop body
LE: loop exit
PB: predicated region body
PF: predicated region fallthrough
CT: control target
= control target key end

     0   :  { %vm61_vm0 = vcmask 392192   ;;  %vm282_vm1 = vcmask 261120   ;;  %s1564_s1 = inlined_call_operand.vmem [shape: f32[48,32], index: 1, kind: input, shape index: {}]   ;;  %s1565_s0 = inlined_call_operand.vmem [shape: f32[128,48], index: 0, kind: input, shape index: {}]   ;;  %s1566_s3 = inlined_call_operand.vmem [shape: f32[32,32], index: 3, kind: input, shape index: {}]   ;;  %s1567_s5 = inlined_call_operand.vmem [shape: f32[32,32], index: 5, kind: input, shape index: {}]   ;;  %s1568_s2 = inlined_call_operand.vmem [shape: f32[1,32], index: 2, kind: input, shape index: {}]   ;;  %s1569_s7 = inlined_call_operand.vmem [shape: f32[32,32], index: 7, kind: input, shape index: {}]   ;;  %s1570_s4 = inlined_call_operand.vmem [shape: f32[1,32], index: 4, kind: input, shape index: {}]   ;;  %s1571_s6 = inlined_call_operand.vmem [shape: f32[1,32], index: 6, kind: input, shape index: {}]   ;;  %s1572_s8 = inlined_call_operand.vmem [shape: f32[1,32], index: 8, kind: input, shape index: {}]   ;;  %s1573_s9 = inlined_call_operand.vmem [shape: f32[128,32], index: 9, kind: output, shape index: {}]  }
   0x1   :  { %v48_v0 = vld [vmem:[%s1564_s1] sm:$0xff]  ;;  %v49_v1 = vld [vmem:[%s1564_s1 + $0x8] sm:$0xff]  ;;  %v50_v2 = vld [vmem:[%s1564_s1 + $0x10] sm:$0xff] }
   0x2   :  { %v1218_v3 = vpack.c.bf16 %v49_v1, %v48_v0  ;;  %v51_v4 = vld [vmem:[%s1564_s1 + $0x18] sm:$0xff]  ;;  %v52_v6 = vld [vmem:[%s1564_s1 + $0x20] sm:$0xff]  ;;  %v53_v7 = vld [vmem:[%s1564_s1 + $0x28] sm:$0xff] }
   0x3   :  { %v1222_v5 = vpack.c.bf16 %v51_v4, %v50_v2  ;;  %v32_v8 = vld [vmem:[%s1565_s0] sm:$0xff]  ;;  %v1226_v9 = vpack.c.bf16 %v53_v7, %v52_v6  ;;  %v272_v11 = vld [vmem:[%s1566_s3 + $0x8] sm:$0xff]  ;;  %v34_v14 = vld [vmem:[%s1565_s0 + $0x10] sm:$0xff] }
   0x4   :  { %1219 = vmatprep.subr.bf16.mxu0 %v1218_v3  ;;  %1098 = vmatprep.mubr.msk.f32.mxu0 %vm61_vm0, %v32_v8  ;;  %v271_v10 = vld [vmem:[%s1566_s3] sm:$0xff]  ;;  %v33_v13 = vld [vmem:[%s1565_s0 + $0x8] sm:$0xff]  ;;  %v35_v15 = vld [vmem:[%s1565_s0 + $0x18] sm:$0xff] }
   0x5   :  { %1221 = vmatpush3.bf16.msra.mxu0 %v1218_v3  ;;  %v1230_v12 = vpack.c.bf16 %v272_v11, %v271_v10  ;;  %v36_v16 = vld [vmem:[%s1565_s0 + $0x20] sm:$0xff]  ;;  %v37_v17 = vld [vmem:[%s1565_s0 + $0x28] sm:$0xff]  ;;  %v38_v18 = vld [vmem:[%s1565_s0 + $0x30] sm:$0xff] }
   0x6   :  { %1223 = vmatprep.subr.bf16.mxu0 %v1222_v5  ;;  %v39_v19 = vld [vmem:[%s1565_s0 + $0x38] sm:$0xff]  ;;  %v40_v20 = vld [vmem:[%s1565_s0 + $0x40] sm:$0xff]  ;;  %v41_v21 = vld [vmem:[%s1565_s0 + $0x48] sm:$0xff] }
   0x7   :  { %1231 = vmatprep.subr.bf16.mxu1 %v1230_v12  ;;  %v42_v22 = vld [vmem:[%s1565_s0 + $0x50] sm:$0xff]  ;;  %v43_v23 = vld [vmem:[%s1565_s0 + $0x58] sm:$0xff]  ;;  %v44_v24 = vld [vmem:[%s1565_s0 + $0x60] sm:$0xff] }
   0x8   :  { %1233 = vmatpush3.bf16.msra.mxu1 %v1230_v12  ;;  %v45_v25 = vld [vmem:[%s1565_s0 + $0x68] sm:$0xff]  ;;  %v46_v26 = vld [vmem:[%s1565_s0 + $0x70] sm:$0xff]  ;;  %v47_v27 = vld [vmem:[%s1565_s0 + $0x78] sm:$0xff] }
   0x9   :  { %1225 = vmatpush3.bf16.msra.mxu0 %v1222_v5  ;;  %v273_v28 = vld [vmem:[%s1566_s3 + $0x10] sm:$0xff]  ;;  %v274_v29 = vld [vmem:[%s1566_s3 + $0x18] sm:$0xff]  ;;  %v492_v31 = vld [vmem:[%s1567_s5] sm:$0xff] }
   0xa   :  { %1227 = vmatprep.subr.bf16.mxu0 %v1226_v9  ;;  %v1234_v30 = vpack.c.bf16 %v274_v29, %v273_v28  ;;  %v493_v32 = vld [vmem:[%s1567_s5 + $0x8] sm:$0xff]  ;;  %v1407_v34 = vld [vmem:[%s1568_s2] ss:$0 sm:$0xff]  ;;  %v494_v39 = vld [vmem:[%s1567_s5 + $0x10] sm:$0xff] }
   0xb   :  { %v1238_v33 = vpack.c.bf16 %v493_v32, %v492_v31  ;;  %v495_v40 = vld [vmem:[%s1567_s5 + $0x18] sm:$0xff]  ;;  %v953_v28 = vld [vmem:[%s1570_s4] ss:$0 sm:$0xff] }
   0xc   :  { %1235 = vmatprep.subr.bf16.mxu1 %v1234_v30  ;;  %v1242_v46 = vpack.c.bf16 %v495_v40, %v494_v39 }
   0xd   :  { %1229 = vmatpush3.bf16.msra.mxu0 %v1226_v9  ;;  %1237 = vmatpush3.bf16.msra.mxu1 %v1234_v30 }
   0xe   :  { %1239 = vmatprep.subr.bf16.mxu1 %v1238_v33 }
  0x10   :  { %1099 = vmatmul.mubr.msk.f32.vlgmr.msra.gmra.mrb[0].mxu0 %vm61_vm0, %v33_v13 }
  0x11   :  { %1101 = vmatprep.mubr.msk.f32.mxu0 %vm61_vm0, %v34_v14 }
  0x14   :  { %1102 = vmatmul.mubr.msk.f32.gmra.mrb[2].mxu0 %vm61_vm0, %v35_v15 }
  0x15   :  { %1104 = vmatprep.mubr.msk.f32.mxu0 %vm61_vm0, %v36_v16 }
  0x18   :  { %1105 = vmatmul.mubr.msk.f32.gmra.mrb[4].mxu0 %vm61_vm0, %v37_v17 }
  0x19   :  { %1107 = vmatprep.mubr.msk.f32.mxu0 %vm61_vm0, %v38_v18 }
  0x1c   :  { %1108 = vmatmul.mubr.msk.f32.gmra.mrb[6].mxu0 %vm61_vm0, %v39_v19 }
  0x1d   :  { %1110 = vmatprep.mubr.msk.f32.mxu0 %vm61_vm0, %v40_v20 }
  0x20   :  { %1111 = vmatmul.mubr.msk.f32.gmra.mrb[8].mxu0 %vm61_vm0, %v41_v21 }
  0x21   :  { %1113 = vmatprep.mubr.msk.f32.mxu0 %vm61_vm0, %v42_v22  ;;  %v712_v22 = vld [vmem:[%s1569_s7] sm:$0xff] }
  0x24   :  { %1114 = vmatmul.mubr.msk.f32.gmra.mrb[10].mxu0 %vm61_vm0, %v43_v23  ;;  %v713_v23 = vld [vmem:[%s1569_s7 + $0x8] sm:$0xff] }
  0x25   :  { %1116 = vmatprep.mubr.msk.f32.mxu0 %vm61_vm0, %v44_v24  ;;  %v714_v24 = vld [vmem:[%s1569_s7 + $0x10] sm:$0xff] }
  0x28   :  { %1117 = vmatmul.mubr.msk.f32.gmra.mrb[12].mxu0 %vm61_vm0, %v45_v25  ;;  %v1246_v25 = vpack.c.bf16 %v713_v23, %v712_v22 }
  0x29   :  { %1119 = vmatprep.mubr.msk.f32.mxu0 %vm61_vm0, %v46_v26  ;;  %v715_v26 = vld [vmem:[%s1569_s7 + $0x18] sm:$0xff] }
  0x2a   :  { %1247 = vmatprep.subr.bf16.mxu0 %v1246_v25 }
  0x2b   :  { %1249 = vmatpush3.bf16.msra.mxu0 %v1246_v25 }
  0x2c   :  { %1120 = vmatmul.mubr.msk.f32.gmra.mrb[14].mxu0 %vm61_vm0, %v47_v27  ;;  %v1250_v27 = vpack.c.bf16 %v715_v26, %v714_v24 }
  0x2e   :  { %1251 = vmatprep.subr.bf16.mxu0 %v1250_v27 }
  0x2f   :  { %1253 = vmatpush3.bf16.msra.mxu0 %v1250_v27 }
  0xe3   :  { %v1100_v35 = vpop.f32.mrb[0].mxu0 }
  0xe4   :  { %v182_v36 = vadd.f32 %v1100_v35, %v1407_v34  ;;  %v176_v37 = vpop.f32.mrb[1].mxu0 }
  0xe5   :  { %v177_v38 = vadd.f32 %v1407_v34, %v176_v37 }
  0xe6   :  { %v256_v43 = vmax.f32 %v182_v36, 0.0 }
  0xe7   :  { %v255_v41 = vmax.f32 %v177_v38, 0.0  ;;  %v1103_v42 = vpop.f32.mrb[2].mxu0 }
  0xe8   :  { %v192_v44 = vadd.f32 %v1103_v42, %v1407_v34  ;;  %v186_v45 = vpop.f32.mrb[3].mxu0 }
  0xe9   :  { %v187_v47 = vadd.f32 %v1407_v34, %v186_v45  ;;  %1130 = vmatprep.mubr.msk.f32.mxu1 %vm282_vm1, %v255_v41 }
  0xea   :  { %1131 = vmatmul.mubr.msk.f32.vlgmr.msra.gmra.mrb[0].mxu1 %vm282_vm1, %v256_v43  ;;  %v258_v50 = vmax.f32 %v192_v44, 0.0 }
  0xeb   :  { %v257_v48 = vmax.f32 %v187_v47, 0.0  ;;  %v1106_v49 = vpop.f32.mrb[4].mxu0  ;;  %1241 = vmatpush3.bf16.msra.mxu1 %v1238_v33 }
  0xec   :  { %v202_v51 = vadd.f32 %v1106_v49, %v1407_v34  ;;  %v196_v52 = vpop.f32.mrb[5].mxu0  ;;  %1243 = vmatprep.subr.bf16.mxu1 %v1242_v46 }
  0xed   :  { %v197_v53 = vadd.f32 %v1407_v34, %v196_v52  ;;  %1133 = vmatprep.mubr.msk.f32.mxu1 %vm282_vm1, %v257_v48 }
  0xee   :  { %1134 = vmatmul.mubr.msk.f32.gmra.mrb[2].mxu1 %vm282_vm1, %v258_v50  ;;  %v260_v56 = vmax.f32 %v202_v51, 0.0 }
  0xef   :  { %v259_v54 = vmax.f32 %v197_v53, 0.0  ;;  %v1109_v55 = vpop.f32.mrb[6].mxu0  ;;  %1245 = vmatpush3.bf16.msra.mxu1 %v1242_v46 }
  0xf0   :  { %v212_v57 = vadd.f32 %v1109_v55, %v1407_v34  ;;  %v206_v58 = vpop.f32.mrb[7].mxu0 }
  0xf1   :  { %v207_v59 = vadd.f32 %v1407_v34, %v206_v58  ;;  %1136 = vmatprep.mubr.msk.f32.mxu1 %vm282_vm1, %v259_v54 }
  0xf2   :  { %1137 = vmatmul.mubr.msk.f32.gmra.mrb[4].mxu1 %vm282_vm1, %v260_v56  ;;  %v262_v62 = vmax.f32 %v212_v57, 0.0 }
  0xf3   :  { %v261_v60 = vmax.f32 %v207_v59, 0.0  ;;  %v1112_v61 = vpop.f32.mrb[8].mxu0 }
  0xf4   :  { %v222_v63 = vadd.f32 %v1112_v61, %v1407_v34  ;;  %v216_v0 = vpop.f32.mrb[9].mxu0 }
  0xf5   :  { %v217_v1 = vadd.f32 %v1407_v34, %v216_v0  ;;  %1139 = vmatprep.mubr.msk.f32.mxu1 %vm282_vm1, %v261_v60 }
  0xf6   :  { %1140 = vmatmul.mubr.msk.f32.gmra.mrb[6].mxu1 %vm282_vm1, %v262_v62  ;;  %v264_v4 = vmax.f32 %v222_v63, 0.0 }
  0xf7   :  { %v263_v2 = vmax.f32 %v217_v1, 0.0  ;;  %v1115_v3 = vpop.f32.mrb[10].mxu0 }
  0xf8   :  { %v232_v5 = vadd.f32 %v1115_v3, %v1407_v34  ;;  %v226_v6 = vpop.f32.mrb[11].mxu0 }
  0xf9   :  { %v227_v7 = vadd.f32 %v1407_v34, %v226_v6  ;;  %1142 = vmatprep.mubr.msk.f32.mxu1 %vm282_vm1, %v263_v2 }
  0xfa   :  { %1143 = vmatmul.mubr.msk.f32.gmra.mrb[8].mxu1 %vm282_vm1, %v264_v4  ;;  %v266_v10 = vmax.f32 %v232_v5, 0.0 }
  0xfb   :  { %v265_v8 = vmax.f32 %v227_v7, 0.0  ;;  %v1118_v9 = vpop.f32.mrb[12].mxu0 }
  0xfc   :  { %v242_v11 = vadd.f32 %v1118_v9, %v1407_v34  ;;  %v236_v12 = vpop.f32.mrb[13].mxu0 }
  0xfd   :  { %v237_v13 = vadd.f32 %v1407_v34, %v236_v12  ;;  %1145 = vmatprep.mubr.msk.f32.mxu1 %vm282_vm1, %v265_v8 }
  0xfe   :  { %1146 = vmatmul.mubr.msk.f32.gmra.mrb[10].mxu1 %vm282_vm1, %v266_v10  ;;  %v268_v16 = vmax.f32 %v242_v11, 0.0 }
  0xff   :  { %v267_v14 = vmax.f32 %v237_v13, 0.0  ;;  %v1121_v15 = vpop.f32.mrb[14].mxu0  ;;  %v970_v13 = vld [vmem:[%s1571_s6] ss:$0 sm:$0xff] }
 0x100   :  { %v252_v17 = vadd.f32 %v1121_v15, %v1407_v34  ;;  %v246_v18 = vpop.f32.mrb[15].mxu0 }
 0x101   :  { %v247_v19 = vadd.f32 %v1407_v34, %v246_v18  ;;  %1148 = vmatprep.mubr.msk.f32.mxu1 %vm282_vm1, %v267_v14 }
 0x102   :  { %1149 = vmatmul.mubr.msk.f32.gmra.mrb[12].mxu1 %vm282_vm1, %v268_v16  ;;  %v270_v21 = vmax.f32 %v252_v17, 0.0 }
 0x103   :  { %v269_v20 = vmax.f32 %v247_v19, 0.0 }
 0x105   :  { %1151 = vmatprep.mubr.msk.f32.mxu1 %vm282_vm1, %v269_v20 }
 0x106   :  { %1152 = vmatmul.mubr.msk.f32.gmra.mrb[14].mxu1 %vm282_vm1, %v270_v21 }
 0x1bd   :  { %v1132_v29 = vpop.f32.mrb[0].mxu1 }
 0x1be   :  { %v403_v30 = vadd.f32 %v1132_v29, %v953_v28  ;;  %v397_v31 = vpop.f32.mrb[1].mxu1 }
 0x1bf   :  { %v398_v32 = vadd.f32 %v953_v28, %v397_v31 }
 0x1c0   :  { %v477_v35 = vmax.f32 %v403_v30, 0.0 }
 0x1c1   :  { %v476_v33 = vmax.f32 %v398_v32, 0.0  ;;  %v1135_v34 = vpop.f32.mrb[2].mxu1 }
 0x1c2   :  { %v413_v36 = vadd.f32 %v1135_v34, %v953_v28  ;;  %v407_v37 = vpop.f32.mrb[3].mxu1 }
 0x1c3   :  { %v408_v38 = vadd.f32 %v953_v28, %v407_v37  ;;  %1162 = vmatprep.mubr.msk.f32.mxu1 %vm282_vm1, %v476_v33 }
 0x1c4   :  { %1163 = vmatmul.mubr.msk.f32.vlgmr.msra.gmra.mrb[16].mxu1 %vm282_vm1, %v477_v35  ;;  %v479_v41 = vmax.f32 %v413_v36, 0.0 }
 0x1c5   :  { %v478_v39 = vmax.f32 %v408_v38, 0.0  ;;  %v1138_v40 = vpop.f32.mrb[4].mxu1 }
 0x1c6   :  { %v423_v42 = vadd.f32 %v1138_v40, %v953_v28  ;;  %v417_v43 = vpop.f32.mrb[5].mxu1 }
 0x1c7   :  { %v418_v44 = vadd.f32 %v953_v28, %v417_v43  ;;  %1165 = vmatprep.mubr.msk.f32.mxu1 %vm282_vm1, %v478_v39 }
 0x1c8   :  { %1166 = vmatmul.mubr.msk.f32.gmra.mrb[18].mxu1 %vm282_vm1, %v479_v41  ;;  %v481_v47 = vmax.f32 %v423_v42, 0.0 }
 0x1c9   :  { %v480_v45 = vmax.f32 %v418_v44, 0.0  ;;  %v1141_v46 = vpop.f32.mrb[6].mxu1 }
 0x1ca   :  { %v433_v48 = vadd.f32 %v1141_v46, %v953_v28  ;;  %v427_v49 = vpop.f32.mrb[7].mxu1 }
 0x1cb   :  { %v428_v50 = vadd.f32 %v953_v28, %v427_v49  ;;  %1168 = vmatprep.mubr.msk.f32.mxu1 %vm282_vm1, %v480_v45 }
 0x1cc   :  { %1169 = vmatmul.mubr.msk.f32.gmra.mrb[20].mxu1 %vm282_vm1, %v481_v47  ;;  %v483_v53 = vmax.f32 %v433_v48, 0.0 }
 0x1cd   :  { %v482_v51 = vmax.f32 %v428_v50, 0.0  ;;  %v1144_v52 = vpop.f32.mrb[8].mxu1 }
 0x1ce   :  { %v443_v54 = vadd.f32 %v1144_v52, %v953_v28  ;;  %v437_v55 = vpop.f32.mrb[9].mxu1 }
 0x1cf   :  { %v438_v56 = vadd.f32 %v953_v28, %v437_v55  ;;  %1171 = vmatprep.mubr.msk.f32.mxu1 %vm282_vm1, %v482_v51 }
 0x1d0   :  { %1172 = vmatmul.mubr.msk.f32.gmra.mrb[22].mxu1 %vm282_vm1, %v483_v53  ;;  %v485_v59 = vmax.f32 %v443_v54, 0.0 }
 0x1d1   :  { %v484_v57 = vmax.f32 %v438_v56, 0.0  ;;  %v1147_v58 = vpop.f32.mrb[10].mxu1 }
 0x1d2   :  { %v453_v60 = vadd.f32 %v1147_v58, %v953_v28  ;;  %v447_v61 = vpop.f32.mrb[11].mxu1 }
 0x1d3   :  { %v448_v62 = vadd.f32 %v953_v28, %v447_v61  ;;  %1174 = vmatprep.mubr.msk.f32.mxu1 %vm282_vm1, %v484_v57 }
 0x1d4   :  { %1175 = vmatmul.mubr.msk.f32.gmra.mrb[24].mxu1 %vm282_vm1, %v485_v59  ;;  %v487_v1 = vmax.f32 %v453_v60, 0.0 }
 0x1d5   :  { %v486_v63 = vmax.f32 %v448_v62, 0.0  ;;  %v1150_v0 = vpop.f32.mrb[12].mxu1  ;;  %v987_v62 = vld [vmem:[%s1572_s8] ss:$0 sm:$0xff] }
 0x1d6   :  { %v463_v2 = vadd.f32 %v1150_v0, %v953_v28  ;;  %v457_v3 = vpop.f32.mrb[13].mxu1 }
 0x1d7   :  { %v458_v4 = vadd.f32 %v953_v28, %v457_v3  ;;  %1177 = vmatprep.mubr.msk.f32.mxu1 %vm282_vm1, %v486_v63 }
 0x1d8   :  { %1178 = vmatmul.mubr.msk.f32.gmra.mrb[26].mxu1 %vm282_vm1, %v487_v1  ;;  %v489_v7 = vmax.f32 %v463_v2, 0.0 }
 0x1d9   :  { %v488_v5 = vmax.f32 %v458_v4, 0.0  ;;  %v1153_v6 = vpop.f32.mrb[14].mxu1 }
 0x1da   :  { %v473_v8 = vadd.f32 %v1153_v6, %v953_v28  ;;  %v467_v9 = vpop.f32.mrb[15].mxu1 }
 0x1db   :  { %v468_v10 = vadd.f32 %v953_v28, %v467_v9  ;;  %1180 = vmatprep.mubr.msk.f32.mxu1 %vm282_vm1, %v488_v5 }
 0x1dc   :  { %1181 = vmatmul.mubr.msk.f32.gmra.mrb[28].mxu1 %vm282_vm1, %v489_v7  ;;  %v491_v12 = vmax.f32 %v473_v8, 0.0 }
 0x1dd   :  { %v490_v11 = vmax.f32 %v468_v10, 0.0 }
 0x1df   :  { %1183 = vmatprep.mubr.msk.f32.mxu1 %vm282_vm1, %v490_v11 }
 0x1e0   :  { %1184 = vmatmul.mubr.msk.f32.gmra.mrb[30].mxu1 %vm282_vm1, %v491_v12 }
 0x297   :  { %v1164_v14 = vpop.f32.mrb[16].mxu1 }
 0x298   :  { %v623_v15 = vadd.f32 %v1164_v14, %v970_v13  ;;  %v617_v16 = vpop.f32.mrb[17].mxu1 }
 0x299   :  { %v618_v17 = vadd.f32 %v970_v13, %v617_v16 }
 0x29a   :  { %v697_v20 = vmax.f32 %v623_v15, 0.0 }
 0x29b   :  { %v696_v18 = vmax.f32 %v618_v17, 0.0  ;;  %v1167_v19 = vpop.f32.mrb[18].mxu1 }
 0x29c   :  { %v633_v21 = vadd.f32 %v1167_v19, %v970_v13  ;;  %v627_v22 = vpop.f32.mrb[19].mxu1 }
 0x29d   :  { %v628_v23 = vadd.f32 %v970_v13, %v627_v22  ;;  %1194 = vmatprep.mubr.msk.f32.mxu0 %vm282_vm1, %v696_v18 }
 0x29e   :  { %1195 = vmatmul.mubr.msk.f32.vlgmr.msra.gmra.mrb[16].mxu0 %vm282_vm1, %v697_v20  ;;  %v699_v26 = vmax.f32 %v633_v21, 0.0 }
 0x29f   :  { %v698_v24 = vmax.f32 %v628_v23, 0.0  ;;  %v1170_v25 = vpop.f32.mrb[20].mxu1 }
 0x2a0   :  { %v643_v27 = vadd.f32 %v1170_v25, %v970_v13  ;;  %v637_v28 = vpop.f32.mrb[21].mxu1 }
 0x2a1   :  { %v638_v29 = vadd.f32 %v970_v13, %v637_v28  ;;  %1197 = vmatprep.mubr.msk.f32.mxu0 %vm282_vm1, %v698_v24 }
 0x2a2   :  { %1198 = vmatmul.mubr.msk.f32.gmra.mrb[18].mxu0 %vm282_vm1, %v699_v26  ;;  %v701_v32 = vmax.f32 %v643_v27, 0.0 }
 0x2a3   :  { %v700_v30 = vmax.f32 %v638_v29, 0.0  ;;  %v1173_v31 = vpop.f32.mrb[22].mxu1 }
 0x2a4   :  { %v653_v33 = vadd.f32 %v1173_v31, %v970_v13  ;;  %v647_v34 = vpop.f32.mrb[23].mxu1 }
 0x2a5   :  { %v648_v35 = vadd.f32 %v970_v13, %v647_v34  ;;  %1200 = vmatprep.mubr.msk.f32.mxu0 %vm282_vm1, %v700_v30 }
 0x2a6   :  { %1201 = vmatmul.mubr.msk.f32.gmra.mrb[20].mxu0 %vm282_vm1, %v701_v32  ;;  %v703_v38 = vmax.f32 %v653_v33, 0.0 }
 0x2a7   :  { %v702_v36 = vmax.f32 %v648_v35, 0.0  ;;  %v1176_v37 = vpop.f32.mrb[24].mxu1 }
 0x2a8   :  { %v663_v39 = vadd.f32 %v1176_v37, %v970_v13  ;;  %v657_v40 = vpop.f32.mrb[25].mxu1 }
 0x2a9   :  { %v658_v41 = vadd.f32 %v970_v13, %v657_v40  ;;  %1203 = vmatprep.mubr.msk.f32.mxu0 %vm282_vm1, %v702_v36 }
 0x2aa   :  { %1204 = vmatmul.mubr.msk.f32.gmra.mrb[22].mxu0 %vm282_vm1, %v703_v38  ;;  %v705_v44 = vmax.f32 %v663_v39, 0.0 }
 0x2ab   :  { %v704_v42 = vmax.f32 %v658_v41, 0.0  ;;  %v1179_v43 = vpop.f32.mrb[26].mxu1 }
 0x2ac   :  { %v673_v45 = vadd.f32 %v1179_v43, %v970_v13  ;;  %v667_v46 = vpop.f32.mrb[27].mxu1 }
 0x2ad   :  { %v668_v47 = vadd.f32 %v970_v13, %v667_v46  ;;  %1206 = vmatprep.mubr.msk.f32.mxu0 %vm282_vm1, %v704_v42 }
 0x2ae   :  { %1207 = vmatmul.mubr.msk.f32.gmra.mrb[24].mxu0 %vm282_vm1, %v705_v44  ;;  %v707_v50 = vmax.f32 %v673_v45, 0.0 }
 0x2af   :  { %v706_v48 = vmax.f32 %v668_v47, 0.0  ;;  %v1182_v49 = vpop.f32.mrb[28].mxu1 }
 0x2b0   :  { %v683_v51 = vadd.f32 %v1182_v49, %v970_v13  ;;  %v677_v52 = vpop.f32.mrb[29].mxu1 }
 0x2b1   :  { %v678_v53 = vadd.f32 %v970_v13, %v677_v52  ;;  %1209 = vmatprep.mubr.msk.f32.mxu0 %vm282_vm1, %v706_v48 }
 0x2b2   :  { %1210 = vmatmul.mubr.msk.f32.gmra.mrb[26].mxu0 %vm282_vm1, %v707_v50  ;;  %v709_v56 = vmax.f32 %v683_v51, 0.0 }
 0x2b3   :  { %v708_v54 = vmax.f32 %v678_v53, 0.0  ;;  %v1185_v55 = vpop.f32.mrb[30].mxu1 }
 0x2b4   :  { %v693_v57 = vadd.f32 %v1185_v55, %v970_v13  ;;  %v687_v58 = vpop.f32.mrb[31].mxu1 }
 0x2b5   :  { %v688_v59 = vadd.f32 %v970_v13, %v687_v58  ;;  %1212 = vmatprep.mubr.msk.f32.mxu0 %vm282_vm1, %v708_v54 }
 0x2b6   :  { %1213 = vmatmul.mubr.msk.f32.gmra.mrb[28].mxu0 %vm282_vm1, %v709_v56  ;;  %v711_v61 = vmax.f32 %v693_v57, 0.0 }
 0x2b7   :  { %v710_v60 = vmax.f32 %v688_v59, 0.0 }
 0x2b9   :  { %1215 = vmatprep.mubr.msk.f32.mxu0 %vm282_vm1, %v710_v60 }
 0x2ba   :  { %1216 = vmatmul.mubr.msk.f32.gmra.mrb[30].mxu0 %vm282_vm1, %v711_v61 }
 0x371   :  { %v1196_v63 = vpop.f32.mrb[16].mxu0 }
 0x372   :  { %v843_v0 = vadd.f32 %v1196_v63, %v987_v62  ;;  %v837_v1 = vpop.f32.mrb[17].mxu0 }
 0x373   :  { %v838_v2 = vadd.f32 %v987_v62, %v837_v1 }
 0x374   :  { %917 = vst.msk [vmem:[%s1573_s9 + $0x8] sm:$0xff] %vm282_vm1, %v843_v0 }
 0x375   :  { %916 = vst.msk [vmem:[%s1573_s9] sm:$0xff] %vm282_vm1, %v838_v2  ;;  %v1199_v3 = vpop.f32.mrb[18].mxu0 }
 0x376   :  { %v853_v4 = vadd.f32 %v1199_v3, %v987_v62  ;;  %v847_v5 = vpop.f32.mrb[19].mxu0 }
 0x377   :  { %v848_v6 = vadd.f32 %v987_v62, %v847_v5 }
 0x378   :  { %919 = vst.msk [vmem:[%s1573_s9 + $0x18] sm:$0xff] %vm282_vm1, %v853_v4 }
 0x379   :  { %918 = vst.msk [vmem:[%s1573_s9 + $0x10] sm:$0xff] %vm282_vm1, %v848_v6  ;;  %v1202_v7 = vpop.f32.mrb[20].mxu0 }
 0x37a   :  { %v863_v8 = vadd.f32 %v1202_v7, %v987_v62  ;;  %v857_v9 = vpop.f32.mrb[21].mxu0 }
 0x37b   :  { %v858_v10 = vadd.f32 %v987_v62, %v857_v9 }
 0x37c   :  { %921 = vst.msk [vmem:[%s1573_s9 + $0x28] sm:$0xff] %vm282_vm1, %v863_v8 }
 0x37d   :  { %920 = vst.msk [vmem:[%s1573_s9 + $0x20] sm:$0xff] %vm282_vm1, %v858_v10  ;;  %v1205_v11 = vpop.f32.mrb[22].mxu0 }
 0x37e   :  { %v873_v12 = vadd.f32 %v1205_v11, %v987_v62  ;;  %v867_v13 = vpop.f32.mrb[23].mxu0 }
 0x37f   :  { %v868_v14 = vadd.f32 %v987_v62, %v867_v13 }
 0x380   :  { %923 = vst.msk [vmem:[%s1573_s9 + $0x38] sm:$0xff] %vm282_vm1, %v873_v12 }
 0x381   :  { %922 = vst.msk [vmem:[%s1573_s9 + $0x30] sm:$0xff] %vm282_vm1, %v868_v14  ;;  %v1208_v15 = vpop.f32.mrb[24].mxu0 }
 0x382   :  { %v883_v16 = vadd.f32 %v1208_v15, %v987_v62  ;;  %v877_v17 = vpop.f32.mrb[25].mxu0 }
 0x383   :  { %v878_v18 = vadd.f32 %v987_v62, %v877_v17 }
 0x384   :  { %925 = vst.msk [vmem:[%s1573_s9 + $0x48] sm:$0xff] %vm282_vm1, %v883_v16 }
 0x385   :  { %924 = vst.msk [vmem:[%s1573_s9 + $0x40] sm:$0xff] %vm282_vm1, %v878_v18  ;;  %v1211_v19 = vpop.f32.mrb[26].mxu0 }
 0x386   :  { %v893_v20 = vadd.f32 %v1211_v19, %v987_v62  ;;  %v887_v21 = vpop.f32.mrb[27].mxu0 }
 0x387   :  { %v888_v22 = vadd.f32 %v987_v62, %v887_v21 }
 0x388   :  { %927 = vst.msk [vmem:[%s1573_s9 + $0x58] sm:$0xff] %vm282_vm1, %v893_v20 }
 0x389   :  { %926 = vst.msk [vmem:[%s1573_s9 + $0x50] sm:$0xff] %vm282_vm1, %v888_v22  ;;  %v1214_v23 = vpop.f32.mrb[28].mxu0 }
 0x38a   :  { %v903_v24 = vadd.f32 %v1214_v23, %v987_v62  ;;  %v897_v25 = vpop.f32.mrb[29].mxu0 }
 0x38b   :  { %v898_v26 = vadd.f32 %v987_v62, %v897_v25 }
 0x38c   :  { %929 = vst.msk [vmem:[%s1573_s9 + $0x68] sm:$0xff] %vm282_vm1, %v903_v24 }
 0x38d   :  { %928 = vst.msk [vmem:[%s1573_s9 + $0x60] sm:$0xff] %vm282_vm1, %v898_v26  ;;  %v1217_v27 = vpop.f32.mrb[30].mxu0 }
 0x38e   :  { %v913_v28 = vadd.f32 %v1217_v27, %v987_v62  ;;  %v907_v29 = vpop.f32.mrb[31].mxu0 }
 0x38f   :  { %v908_v30 = vadd.f32 %v987_v62, %v907_v29 }
 0x390   :  { %931 = vst.msk [vmem:[%s1573_s9 + $0x78] sm:$0xff] %vm282_vm1, %v913_v28 }
 0x391   :  { %930 = vst.msk [vmem:[%s1573_s9 + $0x70] sm:$0xff] %vm282_vm1, %v908_v30 }

</bundles_post_ra>
